<compile_context>
chip_gen: v5e
topology: v5e:2x2
jax: 0.10.0
libtpu: 0.0.40
codegen_flags: <defaults>
</compile_context>

<pallas_src>
import functools

import jax
import jax.numpy as jnp
from jax.experimental import pallas as pl
from jax.experimental.pallas import tpu as pltpu


# ----------------------------- in-kernel helpers ----------------------------
def _topk_mask(probs, k):
    """torch: zeros_like(probs).scatter_(1, topk_idx, topk_vals) -- unnormalized.

    Tie-break: lowest-index maximum (float-equality); for exact ties this may
    differ from torch.topk ordering, but the kept values are identical.
    """
    tb, n_e = probs.shape
    col = jax.lax.broadcasted_iota(jnp.int32, (tb, n_e), 1)
    keep = jnp.zeros((tb, n_e), dtype=jnp.bool_)
    remaining = probs
    for _ in range(k):                      # k is a static Python int -> unrolled
        m = jnp.max(remaining, axis=1, keepdims=True)
        is_max = remaining == m
        idx = jnp.min(jnp.where(is_max, col, n_e), axis=1, keepdims=True)  # first max
        sel = col == idx
        keep = jnp.logical_or(keep, sel)
        remaining = jnp.where(sel, -jnp.inf, remaining)
    return jnp.where(keep, probs, 0.0)


# ------------------------------- fused kernel -------------------------------
def _moe_fused_kernel(
    x1_ref, wg_ref, bg_ref, x2_ref, w1_ref, b1_ref, w2_ref, b2_ref,
    out_ref, probs_sc, pe_sc, acc_sc, *, top_k,
):
    e = pl.program_id(1)
    h = pl.program_id(2)
    n_e = pl.num_programs(1)
    n_h = pl.num_programs(2)

    # --- gate: compute softmax (+ optional top-k mask) once per batch tile ---
    @pl.when(jnp.logical_and(e == 0, h == 0))
    def _():
        acc_sc[...] = jnp.zeros_like(acc_sc)
        logits = (
            jnp.dot(x1_ref[...], wg_ref[...], preferred_element_type=jnp.float32)
            + bg_ref[...]
        )
        m = jnp.max(logits, axis=1, keepdims=True)
        ex = jnp.exp(logits - m)
        probs = ex / jnp.sum(ex, axis=1, keepdims=True)
        if top_k is not None:
            probs = _topk_mask(probs, top_k)
        probs_sc[...] = probs

    # --- gate weight for this expert: computed once per (b, e), reused over h
    @pl.when(h == 0)
    def _():
        probs = probs_sc[...]
        col = jax.lax.broadcasted_iota(jnp.int32, probs.shape, 1)
        pe_sc[...] = jnp.sum(jnp.where(col == e, probs, 0.0), axis=1, keepdims=True)

    p_e = pe_sc[...]                                            # (TB, 1) f32

    # --- expert MLP partial (H tile): relu(x2 @ W1_blk + b1_blk) @ W2_blk ----
    hact = (
        jnp.dot(x2_ref[...], w1_ref[0], preferred_element_type=jnp.float32)
        + b1_ref[0]
    )
    hact = jnp.maximum(hact, 0.0)
    y = jnp.dot(hact.astype(jnp.bfloat16), w2_ref[0],
                preferred_element_type=jnp.float32)
    acc_sc[...] += p_e * y

    # --- bias b2 added exactly once per expert (last H tile) -----------------
    @pl.when(h == n_h - 1)
    def _():
        acc_sc[...] += p_e * b2_ref[0]

    # --- single lane-dense store of the finished batch tile ------------------
    @pl.when(jnp.logical_and(e == n_e - 1, h == n_h - 1))
    def _():
        out_ref[...] = acc_sc[...].astype(out_ref.dtype)


# --------------------------- tiling / config helpers -------------------------
def _round_up(x, m):
    return ((x + m - 1) // m) * m


def _tpu_config():
    """Generation-aware caps: (batch-tile cap, vmem limit, H-tile multiple, min batch programs)."""
    kind = ""
    try:
        kind = jax.devices()[0].device_kind.lower()
    except Exception:
        pass
    if "v7" in kind or "7x" in kind:
        # 64 MiB physical VMEM per TC, 2 TCs -> need >=2 batch programs, tight VMEM.
        return dict(tb_cap=512, vmem_limit=52 << 20, th_mult=256, min_batch_programs=2)
    if "v6" in kind:
        # 128 MiB VMEM, highest FLOP/byte requirement -> biggest batch tile.
        return dict(tb_cap=1024, vmem_limit=100 << 20, th_mult=256, min_batch_programs=1)
    if "v5p" in kind:
        return dict(tb_cap=512, vmem_limit=96 << 20, th_mult=128, min_batch_programs=1)
    if "v5" in kind:  # v5e / v5 lite
        return dict(tb_cap=256, vmem_limit=96 << 20, th_mult=128, min_batch_programs=1)
    # unknown generation: conservative
    return dict(tb_cap=256, vmem_limit=48 << 20, th_mult=128, min_batch_programs=1)


def _pick_batch_tile(B, cap, min_programs):
    """Returns (TB, B_pad) with B_pad % TB == 0 and B_pad // TB >= min_programs."""
    cap = max(8, (cap // 8) * 8)
    if B <= cap and min_programs <= 1:
        return B, B
    n_b = max(min_programs, -(-B // cap))
    tb = _round_up(-(-B // n_b), 8)
    tb = min(tb, _round_up(B, 8))
    n_b = max(-(-B // tb), min_programs)
    return tb, n_b * tb


def _pick_h_tile(H, D, O_pad, budget_bytes, th_mult):
    """Returns (TH, H_pad).  Budget covers the DOUBLE-BUFFERED bf16 W1+W2 slabs."""
    def slab(th):
        return 2 * (D * th + th * O_pad) * 2   # 2 pipeline bufs x bf16 bytes

    if slab(H) <= budget_bytes:
        return H, H                             # whole hidden dim fits; no padding
    per_th = 4 * (D + O_pad)                    # bytes per unit of TH (double-buffered)
    th_max = max(th_mult, (budget_bytes // per_th // th_mult) * th_mult)
    n_h = -(-H // th_max)
    th = _round_up(-(-H // n_h), th_mult)
    return th, n_h * th


# --------------------------------- wrappers ---------------------------------
def moe_fused(x1, wg, bg, x2, w1, b1, w2, b2, top_routing=None):
    B, D = x2.shape
    E = wg.shape[1]
    H = w1.shape[2]
    O = w2.shape[2]

    cfg = _tpu_config()
    vmem_limit = cfg["vmem_limit"]

    # Lane-dense output: pad O to a multiple of 128 (full-width MXU N / unmasked vst).
    O_pad = _round_up(O, 128)

    # Batch tile: generation cap, clamped so per-row VMEM cost stays modest.
    act_row_bytes = 2 * D * 4 + 2 * D * 2 + 3 * O_pad * 4 + (E + 1) * 4
    tb_cap = min(cfg["tb_cap"], max(8, (vmem_limit // 4) // act_row_bytes))
    TB, B_pad = _pick_batch_tile(B, tb_cap, cfg["min_batch_programs"])

    # Hidden tile: double-buffer-aware weight budget (~45% of the VMEM limit minus
    # activation/scratch bytes).
    fixed_bytes = TB * act_row_bytes + 2 * (D * E + E) * 4 + 2 * O_pad * 4
    weight_budget = max(2 << 20, int(vmem_limit * 0.45) - fixed_bytes)
    TH, H_pad = _pick_h_tile(H, D, O_pad, weight_budget, cfg["th_mult"])

    n_b, n_h = B_pad // TB, H_pad // TH

    # Zero-pad to tiled shapes (exact: padded rows/cols contribute 0, sliced off).
    x1p = jnp.pad(x1, ((0, B_pad - B), (0, 0)))
    x2p = jnp.pad(x2, ((0, B_pad - B), (0, 0)))
    w1p = jnp.pad(w1, ((0, 0), (0, 0), (0, H_pad - H)))
    b1p = jnp.pad(b1, ((0, 0), (0, 0), (0, H_pad - H)))
    w2p = jnp.pad(w2, ((0, 0), (0, H_pad - H), (0, O_pad - O)))
    b2p = jnp.pad(b2, ((0, 0), (0, 0), (0, O_pad - O)))

    kernel = functools.partial(_moe_fused_kernel, top_k=top_routing)

    out = pl.pallas_call(
        kernel,
        out_shape=jax.ShapeDtypeStruct((B_pad, O_pad), jnp.float32),
        grid_spec=pltpu.PrefetchScalarGridSpec(
            num_scalar_prefetch=0,
            grid=(n_b, E, n_h),
            in_specs=[
                pl.BlockSpec((TB, D), lambda b, e, h: (b, 0)),            # x1 (f32)
                pl.BlockSpec((D, E), lambda b, e, h: (0, 0)),             # Wg (f32)
                pl.BlockSpec((1, E), lambda b, e, h: (0, 0)),             # bg (f32)
                pl.BlockSpec((TB, D), lambda b, e, h: (b, 0)),            # x2 (bf16)
                pl.BlockSpec((1, D, TH), lambda b, e, h: (e, 0, h)),      # W1[e] (bf16)
                pl.BlockSpec((1, 1, TH), lambda b, e, h: (e, 0, h)),      # b1[e] (f32)
                pl.BlockSpec((1, TH, O_pad), lambda b, e, h: (e, h, 0)),  # W2[e] (bf16)
                pl.BlockSpec((1, 1, O_pad), lambda b, e, h: (e, 0, 0)),   # b2[e] (f32)
            ],
            out_specs=pl.BlockSpec((TB, O_pad), lambda b, e, h: (b, 0)),
            scratch_shapes=[
                pltpu.VMEM((TB, E), jnp.float32),       # gate probs (per batch tile)
                pltpu.VMEM((TB, 1), jnp.float32),       # p_e for current expert
                pltpu.VMEM((TB, O_pad), jnp.float32),   # fp32 output accumulator
            ],
        ),
        compiler_params=pltpu.CompilerParams(
            dimension_semantics=("parallel", "arbitrary", "arbitrary"),
            vmem_limit_bytes=vmem_limit,
        ),
    )(x1p, wg, bg, x2p, w1p, b1p, w2p, b2p)

    return out[:B, :O]


@functools.partial(jax.jit, static_argnames=("top_routing",))
def moe_forward(params, x1, x2, top_routing=None):
    return moe_fused(
        x1.astype(jnp.float32),
        params["wg"].astype(jnp.float32),
        params["bg"].astype(jnp.float32),
        x2.astype(jnp.bfloat16),
        params["w1"].astype(jnp.bfloat16),
        params["b1"].astype(jnp.float32),
        params["w2"].astype(jnp.bfloat16),
        params["b2"].astype(jnp.float32),
        top_routing=top_routing,
    )


# ------------------------- pure-JAX reference checks -------------------------
def _apply_top_routing(gate_probs, k):
    top_vals, top_idx = jax.lax.top_k(gate_probs, k)
    onehot = jax.nn.one_hot(top_idx, gate_probs.shape[1], dtype=gate_probs.dtype)
    return jnp.einsum("bk,bke->be", top_vals, onehot)


def moe_reference(params, x1, x2, top_routing=None, use_bf16=False):
    logits = x1 @ params["wg"] + params["bg"][0]
    gate_probs = jax.nn.softmax(logits, axis=1)
    if top_routing is not None:
        gate_probs = _apply_top_routing(gate_probs, top_routing)
    if use_bf16:
        x2c = x2.astype(jnp.bfloat16)
        w1c = params["w1"].astype(jnp.bfloat16)
        w2c = params["w2"].astype(jnp.bfloat16)
    else:
        x2c, w1c, w2c = x2, params["w1"], params["w2"]
    h = jnp.einsum("bd,edh->ebh", x2c, w1c,
                   preferred_element_type=jnp.float32) + params["b1"]
    h = jnp.maximum(h, 0.0)
    if use_bf16:
        h = h.astype(jnp.bfloat16)
    y = jnp.einsum("ebh,eho->ebo", h, w2c,
                   preferred_element_type=jnp.float32) + params["b2"]
    return jnp.einsum("be,ebo->bo", gate_probs, y)


if __name__ == "__main__":
    # small shapes consistent with the module (hidden = input_dim * 10)
    B, D, O, E = 4, 32, 16, 4
    H = D * 10
    TOP_ROUTING = 2

    key = jax.random.PRNGKey(0)
    ks = jax.random.split(key, 8)
    scale = 0.1
    params = {
        "wg": scale * jax.random.normal(ks[0], (D, E), jnp.float32),
        "bg": scale * jax.random.normal(ks[1], (1, E), jnp.float32),
        "w1": scale * jax.random.normal(ks[2], (E, D, H), jnp.float32),
        "b1": scale * jax.random.normal(ks[3], (E, 1, H), jnp.float32),
        "w2": scale * jax.random.normal(ks[4], (E, H, O), jnp.float32),
        "b2": scale * jax.random.normal(ks[5], (E, 1, O), jnp.float32),
    }
    x1 = jax.random.normal(ks[6], (B, D), jnp.float32)
    x2 = jax.random.normal(ks[7], (B, D), jnp.float32)

    out = moe_forward(params, x1, x2, top_routing=TOP_ROUTING)
    out = jax.block_until_ready(out)
    assert out.shape == (B, O)

    # tight check vs a bf16-matched reference (same quantization path)
    ref_bf16 = moe_reference(params, x1, x2, top_routing=TOP_ROUTING, use_bf16=True)
    assert jnp.allclose(out, ref_bf16, rtol=5e-3, atol=5e-3), "mismatch vs bf16 ref"

    # loose sanity check vs the full-fp32 reference (bf16 weight quantization)
    ref_f32 = moe_reference(params, x1, x2, top_routing=TOP_ROUTING, use_bf16=False)
    assert jnp.allclose(out, ref_f32, rtol=5e-2, atol=5e-2), "mismatch vs fp32 ref"

    print("KERNEL_OK")
</pallas_src>

<mosaic_0001>
module attributes {stable_mosaic.version = 11 : i64} {
  func.func @_moe_fused_kernel(%arg0: i32, %arg1: i32, %arg2: i32, %arg3: memref<4x32xf32, #tpu.memory_space<vmem>>, %arg4: memref<32x4xf32, #tpu.memory_space<vmem>>, %arg5: memref<1x4xf32, #tpu.memory_space<vmem>>, %arg6: memref<4x32xbf16, #tpu.memory_space<vmem>>, %arg7: memref<1x32x320xbf16, #tpu.memory_space<vmem>>, %arg8: memref<1x1x320xf32, #tpu.memory_space<vmem>>, %arg9: memref<1x320x128xbf16, #tpu.memory_space<vmem>>, %arg10: memref<1x1x128xf32, #tpu.memory_space<vmem>>, %arg11: memref<4x128xf32, #tpu.memory_space<vmem>>, %arg12: memref<4x4xf32, #tpu.memory_space<vmem>>, %arg13: memref<4x1xf32, #tpu.memory_space<vmem>>, %arg14: memref<4x128xf32, #tpu.memory_space<vmem>>) attributes {dimension_semantics = [#tpu.dimension_semantics<parallel>, #tpu.dimension_semantics<arbitrary>, #tpu.dimension_semantics<arbitrary>], iteration_bounds = array<i64: 1, 4, 1>, scalar_prefetch = 0 : i64, scratch_operands = 3 : i64, tpu.core_type = #tpu.core_type<tc>, window_params = [{transform_indices = @transform_0, window_bounds = array<i64: 4, 32>}, {pipeline_mode = #tpu.pipeline_mode<synchronous>, transform_indices = @transform_1, window_bounds = array<i64: 32, 4>}, {pipeline_mode = #tpu.pipeline_mode<synchronous>, transform_indices = @transform_2, window_bounds = array<i64: 1, 4>}, {transform_indices = @transform_3, window_bounds = array<i64: 4, 32>}, {transform_indices = @transform_4, window_bounds = array<i64: 1, 32, 320>}, {transform_indices = @transform_5, window_bounds = array<i64: 1, 1, 320>}, {transform_indices = @transform_6, window_bounds = array<i64: 1, 320, 128>}, {transform_indices = @transform_7, window_bounds = array<i64: 1, 1, 128>}, {transform_indices = @transform_8, window_bounds = array<i64: 4, 128>}]} {
    %c0_i32 = arith.constant 0 : i32
    %0 = arith.cmpi eq, %arg1, %c0_i32 : i32
    %c0_i32_0 = arith.constant 0 : i32
    %1 = arith.cmpi eq, %arg2, %c0_i32_0 : i32
    %2 = arith.andi %0, %1 : i1
    %3 = arith.extui %2 : i1 to i32
    %c0_i32_1 = arith.constant 0 : i32
    %4 = arith.cmpi ne, %3, %c0_i32_1 : i32
    scf.if %4 {
      %cst_26 = arith.constant 0.000000e+00 : f32
      %36 = vector.broadcast %cst_26 : f32 to vector<4x128xf32>
      %c0_27 = arith.constant 0 : index
      %c0_28 = arith.constant 0 : index
      %37 = vector.load %arg14[%c0_27, %c0_28] : memref<4x128xf32, #tpu.memory_space<vmem>>, vector<4x128xf32>
      tpu.vector_store %arg14[%c0_27, %c0_28], %36 {strides = array<i32>} : memref<4x128xf32, #tpu.memory_space<vmem>>, vector<4x128xf32>,
      %c0_29 = arith.constant 0 : index
      %c0_30 = arith.constant 0 : index
      %38 = vector.load %arg3[%c0_29, %c0_30] : memref<4x32xf32, #tpu.memory_space<vmem>>, vector<4x32xf32>
      %c0_31 = arith.constant 0 : index
      %c0_32 = arith.constant 0 : index
      %39 = vector.load %arg4[%c0_31, %c0_32] : memref<32x4xf32, #tpu.memory_space<vmem>>, vector<32x4xf32>
      %cst_33 = arith.constant dense<0.000000e+00> : vector<4x4xf32>
      %40 = tpu.matmul %38, %39, %cst_33 {dimension_numbers = #tpu.dot_dimension_numbers<[1], [0], [0], [1], [0, 0, 1, 1], [], []>} : vector<4x32xf32>, vector<32x4xf32>, vector<4x4xf32> -> vector<4x4xf32>
      %c0_34 = arith.constant 0 : index
      %c0_35 = arith.constant 0 : index
      %41 = vector.load %arg5[%c0_34, %c0_35] : memref<1x4xf32, #tpu.memory_space<vmem>>, vector<1x4xf32>
      %42 = vector.broadcast %41 : vector<1x4xf32> to vector<4x4xf32>
      %43 = arith.addf %40, %42 : vector<4x4xf32>
      %cst_36 = arith.constant dense<0xFF800000> : vector<4xf32>
      %44 = vector.multi_reduction <maximumf>, %43, %cst_36 [1] : vector<4x4xf32> to vector<4xf32>
      %45 = vector.shape_cast %44 : vector<4xf32> to vector<4x1xf32>
      %46 = vector.broadcast %45 : vector<4x1xf32> to vector<4x4xf32>
      %47 = arith.subf %43, %46 : vector<4x4xf32>
      %48 = math.exp %47 : vector<4x4xf32>
      %cst_37 = arith.constant dense<0.000000e+00> : vector<4xf32>
      %49 = vector.multi_reduction <add>, %48, %cst_37 [1] : vector<4x4xf32> to vector<4xf32>
      %50 = vector.shape_cast %49 : vector<4xf32> to vector<4x1xf32>
      %51 = vector.broadcast %50 : vector<4x1xf32> to vector<4x4xf32>
      %52 = arith.divf %48, %51 : vector<4x4xf32>
      %53 = tpu.iota {dimensions = array<i32: 1>} : vector<4x4xi32>
      %false = arith.constant false
      %54 = vector.broadcast %false : i1 to vector<4x4xi1>
      %cst_38 = arith.constant dense<0xFF800000> : vector<4xf32>
      %55 = vector.multi_reduction <maximumf>, %52, %cst_38 [1] : vector<4x4xf32> to vector<4xf32>
      %56 = vector.shape_cast %55 : vector<4xf32> to vector<4x1xf32>
      %57 = vector.broadcast %56 : vector<4x1xf32> to vector<4x4xf32>
      %58 = arith.cmpf oeq, %52, %57 : vector<4x4xf32>
      %c4_i32 = arith.constant 4 : i32
      %59 = vector.broadcast %c4_i32 : i32 to vector<4x4xi32>
      %60 = arith.select %58, %53, %59 : vector<4x4xi1>, vector<4x4xi32>
      %cst_39 = arith.constant dense<2147483647> : vector<4xi32>
      %61 = vector.multi_reduction <minsi>, %60, %cst_39 [1] : vector<4x4xi32> to vector<4xi32>
      %62 = vector.shape_cast %61 : vector<4xi32> to vector<4x1xi32>
      %63 = vector.broadcast %62 : vector<4x1xi32> to vector<4x4xi32>
      %64 = arith.cmpi eq, %53, %63 : vector<4x4xi32>
      %65 = arith.ori %54, %64 : vector<4x4xi1>
      %cst_40 = arith.constant 0xFF800000 : f32
      %66 = vector.broadcast %cst_40 : f32 to vector<4x4xf32>
      %67 = arith.select %64, %66, %52 : vector<4x4xi1>, vector<4x4xf32>
      %cst_41 = arith.constant dense<0xFF800000> : vector<4xf32>
      %68 = vector.multi_reduction <maximumf>, %67, %cst_41 [1] : vector<4x4xf32> to vector<4xf32>
      %69 = vector.shape_cast %68 : vector<4xf32> to vector<4x1xf32>
      %70 = vector.broadcast %69 : vector<4x1xf32> to vector<4x4xf32>
      %71 = arith.cmpf oeq, %67, %70 : vector<4x4xf32>
      %c4_i32_42 = arith.constant 4 : i32
      %72 = vector.broadcast %c4_i32_42 : i32 to vector<4x4xi32>
      %73 = arith.select %71, %53, %72 : vector<4x4xi1>, vector<4x4xi32>
      %cst_43 = arith.constant dense<2147483647> : vector<4xi32>
      %74 = vector.multi_reduction <minsi>, %73, %cst_43 [1] : vector<4x4xi32> to vector<4xi32>
      %75 = vector.shape_cast %74 : vector<4xi32> to vector<4x1xi32>
      %76 = vector.broadcast %75 : vector<4x1xi32> to vector<4x4xi32>
      %77 = arith.cmpi eq, %53, %76 : vector<4x4xi32>
      %78 = arith.ori %65, %77 : vector<4x4xi1>
      %cst_44 = arith.constant 0.000000e+00 : f32
      %79 = vector.broadcast %cst_44 : f32 to vector<4x4xf32>
      %80 = arith.select %78, %52, %79 : vector<4x4xi1>, vector<4x4xf32>
      %c0_45 = arith.constant 0 : index
      %c0_46 = arith.constant 0 : index
      %81 = vector.load %arg12[%c0_45, %c0_46] : memref<4x4xf32, #tpu.memory_space<vmem>>, vector<4x4xf32>
      tpu.vector_store %arg12[%c0_45, %c0_46], %80 {strides = array<i32>} : memref<4x4xf32, #tpu.memory_space<vmem>>, vector<4x4xf32>,
    } else {
    }
    %c0_i32_2 = arith.constant 0 : i32
    %5 = arith.cmpi eq, %arg2, %c0_i32_2 : i32
    %6 = arith.extui %5 : i1 to i32
    %c0_i32_3 = arith.constant 0 : i32
    %7 = arith.cmpi ne, %6, %c0_i32_3 : i32
    scf.if %7 {
      %c0_26 = arith.constant 0 : index
      %c0_27 = arith.constant 0 : index
      %36 = vector.load %arg12[%c0_26, %c0_27] : memref<4x4xf32, #tpu.memory_space<vmem>>, vector<4x4xf32>
      %37 = tpu.iota {dimensions = array<i32: 1>} : vector<4x4xi32>
      %38 = vector.broadcast %arg1 : i32 to vector<4x4xi32>
      %39 = arith.cmpi eq, %37, %38 : vector<4x4xi32>
      %cst_28 = arith.constant 0.000000e+00 : f32
      %40 = vector.broadcast %cst_28 : f32 to vector<4x4xf32>
      %41 = arith.select %39, %36, %40 : vector<4x4xi1>, vector<4x4xf32>
      %cst_29 = arith.constant dense<0.000000e+00> : vector<4xf32>
      %42 = vector.multi_reduction <add>, %41, %cst_29 [1] : vector<4x4xf32> to vector<4xf32>
      %43 = vector.shape_cast %42 : vector<4xf32> to vector<4x1xf32>
      %c0_30 = arith.constant 0 : index
      %c0_31 = arith.constant 0 : index
      %44 = vector.load %arg13[%c0_30, %c0_31] : memref<4x1xf32, #tpu.memory_space<vmem>>, vector<4x1xf32>
      tpu.vector_store %arg13[%c0_30, %c0_31], %43 {strides = array<i32>} : memref<4x1xf32, #tpu.memory_space<vmem>>, vector<4x1xf32>,
    } else {
    }
    %c0 = arith.constant 0 : index
    %c0_4 = arith.constant 0 : index
    %8 = vector.load %arg13[%c0, %c0_4] : memref<4x1xf32, #tpu.memory_space<vmem>>, vector<4x1xf32>
    %c0_5 = arith.constant 0 : index
    %c0_6 = arith.constant 0 : index
    %9 = vector.load %arg6[%c0_5, %c0_6] : memref<4x32xbf16, #tpu.memory_space<vmem>>, vector<4x32xbf16>
    %c0_7 = arith.constant 0 : index
    %c0_8 = arith.constant 0 : index
    %c0_9 = arith.constant 0 : index
    %10 = vector.load %arg7[%c0_7, %c0_8, %c0_9] : memref<1x32x320xbf16, #tpu.memory_space<vmem>>, vector<1x32x320xbf16>
    %11 = vector.shape_cast %10 : vector<1x32x320xbf16> to vector<32x320xbf16>
    %cst = arith.constant dense<0.000000e+00> : vector<4x320xf32>
    %12 = tpu.matmul %9, %11, %cst {dimension_numbers = #tpu.dot_dimension_numbers<[1], [0], [0], [1], [0, 0, 1, 1], [], []>} : vector<4x32xbf16>, vector<32x320xbf16>, vector<4x320xf32> -> vector<4x320xf32>
    %c0_10 = arith.constant 0 : index
    %c0_11 = arith.constant 0 : index
    %c0_12 = arith.constant 0 : index
    %13 = vector.load %arg8[%c0_10, %c0_11, %c0_12] : memref<1x1x320xf32, #tpu.memory_space<vmem>>, vector<1x1x320xf32>
    %14 = vector.shape_cast %13 : vector<1x1x320xf32> to vector<1x320xf32>
    %15 = vector.broadcast %14 : vector<1x320xf32> to vector<4x320xf32>
    %16 = arith.addf %12, %15 : vector<4x320xf32>
    %cst_13 = arith.constant 0.000000e+00 : f32
    %17 = vector.broadcast %cst_13 : f32 to vector<4x320xf32>
    %18 = arith.maximumf %16, %17 : vector<4x320xf32>
    %19 = arith.truncf %18 : vector<4x320xf32> to vector<4x320xbf16>
    %c0_14 = arith.constant 0 : index
    %c0_15 = arith.constant 0 : index
    %c0_16 = arith.constant 0 : index
    %20 = vector.load %arg9[%c0_14, %c0_15, %c0_16] : memref<1x320x128xbf16, #tpu.memory_space<vmem>>, vector<1x320x128xbf16>
    %21 = vector.shape_cast %20 : vector<1x320x128xbf16> to vector<320x128xbf16>
    %cst_17 = arith.constant dense<0.000000e+00> : vector<4x128xf32>
    %22 = tpu.matmul %19, %21, %cst_17 {dimension_numbers = #tpu.dot_dimension_numbers<[1], [0], [0], [1], [0, 0, 1, 1], [], []>} : vector<4x320xbf16>, vector<320x128xbf16>, vector<4x128xf32> -> vector<4x128xf32>
    %c0_18 = arith.constant 0 : index
    %c0_19 = arith.constant 0 : index
    %23 = vector.load %arg14[%c0_18, %c0_19] : memref<4x128xf32, #tpu.memory_space<vmem>>, vector<4x128xf32>
    %24 = vector.broadcast %8 : vector<4x1xf32> to vector<4x128xf32>
    %25 = arith.mulf %24, %22 : vector<4x128xf32>
    %26 = arith.addf %23, %25 : vector<4x128xf32>
    %c0_20 = arith.constant 0 : index
    %c0_21 = arith.constant 0 : index
    %27 = vector.load %arg14[%c0_20, %c0_21] : memref<4x128xf32, #tpu.memory_space<vmem>>, vector<4x128xf32>
    tpu.vector_store %arg14[%c0_20, %c0_21], %26 {strides = array<i32>} : memref<4x128xf32, #tpu.memory_space<vmem>>, vector<4x128xf32>,
    %c0_i32_22 = arith.constant 0 : i32
    %28 = arith.cmpi eq, %arg2, %c0_i32_22 : i32
    %29 = arith.extui %28 : i1 to i32
    %c0_i32_23 = arith.constant 0 : i32
    %30 = arith.cmpi ne, %29, %c0_i32_23 : i32
    scf.if %30 {
      %c0_26 = arith.constant 0 : index
      %c0_27 = arith.constant 0 : index
      %36 = vector.load %arg14[%c0_26, %c0_27] : memref<4x128xf32, #tpu.memory_space<vmem>>, vector<4x128xf32>
      %c0_28 = arith.constant 0 : index
      %c0_29 = arith.constant 0 : index
      %c0_30 = arith.constant 0 : index
      %37 = vector.load %arg10[%c0_28, %c0_29, %c0_30] : memref<1x1x128xf32, #tpu.memory_space<vmem>>, vector<1x1x128xf32>
      %38 = vector.shape_cast %37 : vector<1x1x128xf32> to vector<1x128xf32>
      %39 = vector.broadcast %8 : vector<4x1xf32> to vector<4x128xf32>
      %40 = vector.broadcast %38 : vector<1x128xf32> to vector<4x128xf32>
      %41 = arith.mulf %39, %40 : vector<4x128xf32>
      %42 = arith.addf %36, %41 : vector<4x128xf32>
      %c0_31 = arith.constant 0 : index
      %c0_32 = arith.constant 0 : index
      %43 = vector.load %arg14[%c0_31, %c0_32] : memref<4x128xf32, #tpu.memory_space<vmem>>, vector<4x128xf32>
      tpu.vector_store %arg14[%c0_31, %c0_32], %42 {strides = array<i32>} : memref<4x128xf32, #tpu.memory_space<vmem>>, vector<4x128xf32>,
    } else {
    }
    %c3_i32 = arith.constant 3 : i32
    %31 = arith.cmpi eq, %arg1, %c3_i32 : i32
    %c0_i32_24 = arith.constant 0 : i32
    %32 = arith.cmpi eq, %arg2, %c0_i32_24 : i32
    %33 = arith.andi %31, %32 : i1
    %34 = arith.extui %33 : i1 to i32
    %c0_i32_25 = arith.constant 0 : i32
    %35 = arith.cmpi ne, %34, %c0_i32_25 : i32
    scf.if %35 {
      %c0_26 = arith.constant 0 : index
      %c0_27 = arith.constant 0 : index
      %36 = vector.load %arg14[%c0_26, %c0_27] : memref<4x128xf32, #tpu.memory_space<vmem>>, vector<4x128xf32>
      %c0_28 = arith.constant 0 : index
      %c0_29 = arith.constant 0 : index
      %37 = vector.load %arg11[%c0_28, %c0_29] : memref<4x128xf32, #tpu.memory_space<vmem>>, vector<4x128xf32>
      tpu.vector_store %arg11[%c0_28, %c0_29], %36 {strides = array<i32>} : memref<4x128xf32, #tpu.memory_space<vmem>>, vector<4x128xf32>,
    } else {
    }
    return
  }
  func.func @transform_0(%arg0: i32, %arg1: i32, %arg2: i32) -> (i32, i32) {
    %c0_i32 = arith.constant 0 : i32
    %c0_i32_0 = arith.constant 0 : i32
    return %arg0, %c0_i32 : i32, i32
  }
  func.func @transform_1(%arg0: i32, %arg1: i32, %arg2: i32) -> (i32, i32) {
    %c0_i32 = arith.constant 0 : i32
    %c0_i32_0 = arith.constant 0 : i32
    %c0_i32_1 = arith.constant 0 : i32
    return %c0_i32, %c0_i32_0 : i32, i32
  }
  func.func @transform_2(%arg0: i32, %arg1: i32, %arg2: i32) -> (i32, i32) {
    %c0_i32 = arith.constant 0 : i32
    %c0_i32_0 = arith.constant 0 : i32
    %c0_i32_1 = arith.constant 0 : i32
    return %c0_i32, %c0_i32_0 : i32, i32
  }
  func.func @transform_3(%arg0: i32, %arg1: i32, %arg2: i32) -> (i32, i32) {
    %c0_i32 = arith.constant 0 : i32
    %c0_i32_0 = arith.constant 0 : i32
    return %arg0, %c0_i32 : i32, i32
  }
  func.func @transform_4(%arg0: i32, %arg1: i32, %arg2: i32) -> (i32, i32, i32) {
    %c0_i32 = arith.constant 0 : i32
    %c0_i32_0 = arith.constant 0 : i32
    return %arg1, %c0_i32, %arg2 : i32, i32, i32
  }
  func.func @transform_5(%arg0: i32, %arg1: i32, %arg2: i32) -> (i32, i32, i32) {
    %c0_i32 = arith.constant 0 : i32
    %c0_i32_0 = arith.constant 0 : i32
    return %arg1, %c0_i32, %arg2 : i32, i32, i32
  }
  func.func @transform_6(%arg0: i32, %arg1: i32, %arg2: i32) -> (i32, i32, i32) {
    %c0_i32 = arith.constant 0 : i32
    %c0_i32_0 = arith.constant 0 : i32
    return %arg1, %arg2, %c0_i32 : i32, i32, i32
  }
  func.func @transform_7(%arg0: i32, %arg1: i32, %arg2: i32) -> (i32, i32, i32) {
    %c0_i32 = arith.constant 0 : i32
    %c0_i32_0 = arith.constant 0 : i32
    %c0_i32_1 = arith.constant 0 : i32
    return %arg1, %c0_i32, %c0_i32_0 : i32, i32, i32
  }
  func.func @transform_8(%arg0: i32, %arg1: i32, %arg2: i32) -> (i32, i32) {
    %c0_i32 = arith.constant 0 : i32
    %c0_i32_0 = arith.constant 0 : i32
    return %arg0, %c0_i32 : i32, i32
  }
}

</mosaic_0001>

<bundles_post_ra>
// kernel: moe_forward.1
= control target key start
LH: loop header
LB: loop body
LE: loop exit
PB: predicated region body
PF: predicated region fallthrough
CT: control target
= control target key end

     0   :  { %13 = vsyncpa [#allocation6], 0  ;;  %s1347_s27 = smov 0   ;;  %s1349_s28 = smov 0   ;;  %s1484_s0 = inlined_call_operand.vmem [shape: f32[4,32], index: 0, kind: input, shape index: {}]   ;;  %s1485_s1 = inlined_call_operand.vmem [shape: f32[32,4], index: 1, kind: input, shape index: {}]   ;;  %s1486_s2 = inlined_call_operand.vmem [shape: f32[1,4], index: 2, kind: input, shape index: {}]   ;;  %s1487_s3 = inlined_call_operand.vmem [shape: bf16[4,32], index: 3, kind: input, shape index: {}]   ;;  %s1488_s4 = inlined_call_operand.vmem [shape: bf16[4,32,320], index: 4, kind: input, shape index: {}]   ;;  %s1489_s5 = inlined_call_operand.vmem [shape: f32[4,1,320], index: 5, kind: input, shape index: {}]   ;;  %s1490_s6 = inlined_call_operand.vmem [shape: bf16[4,320,128], index: 6, kind: input, shape index: {}]   ;;  %s1491_s7 = inlined_call_operand.vmem [shape: f32[4,1,128], index: 7, kind: input, shape index: {}]   ;;  %s1492_s8 = inlined_call_operand.hbm [shape: f32[4,128], index: 8, kind: output, shape index: {}]  }
   0x1   :  { %s1351_s29 = smov 0  }
   0x2 LB: > { %s1049_s30 = sadd.s32 4294967295, %s1297_s29   ;;  %s34_s9 = sadd.s32 1, %s1293_s28  ;;  %s1297_s29 = sphi %s1351_s29, %s19_s29   ;;  %s1293_s28 = sphi %s1349_s28, %s1494_s28   ;;  %s1289_s27 = sphi %s1347_s27, %s1493_s27  }
   0x3   : > { %p36_p0 = scmp.ge.s32.totalorder %s34_s9, 4  ;;  %p1054_p1 = scmp.ge.s32.totalorder %s1297_s29, 1 }
   0x4   : > { %p348_p2 = scmp.lt.s32.totalorder %s1297_s29, 5 }
   0x5   : > { %s1496_s9 = smov (%p36_p0, %s34_s9), 0 }
   0x6   : > { %p349_p3 = pnand %p1054_p1, %p348_p2 }
   0x7   : > { %p418_p4 = scmp.lt.s32.totalorder (!%p349_p3), %s1289_s27, 3  ;;  %p450_p5 = scmp.eq.s32.totalorder (!%p349_p3), %s1289_s27, 0 }
   0x8   : > { %352 = sbr.rel (%p349_p3) target bundleno = 1464 (0x5b8), region = 52 }
   0xd   : > { %s1371_s10 = scalar_select %p418_p4, %s1289_s27, 3  ;;  %v461_v0 = vld [vmem:[%s1485_s1 + $0x18] sm:$0xff] (%p450_p5)  ;;  %v460_v1 = vld [vmem:[%s1485_s1 + $0x10] sm:$0xff] (%p450_p5)  ;;  %v1299_v2 = vmov (%p450_p5), 0.0   ;;  %v459_v3 = vld [vmem:[%s1485_s1 + $0x8] sm:$0xff] (%p450_p5)  ;;  %vm466_vm0 = vcmask (%p450_p5), 261120   ;;  %v515_v28 = vlaneseq (%p450_p5) }
   0xe   : > { %456 = vst [vmem:[#allocation4] sm:$0xf] (%p450_p5), %v1299_v2  ;;  %482 = vmatpush.msra.mxu0 (%p450_p5), %v461_v0  ;;  %v458_v4 = vld [vmem:[%s1485_s1] sm:$0xff] (%p450_p5)  ;;  %vm490_vm1 = vcmask (%p450_p5), 27648  }
   0xf   : > { %s1200_s11 = smul.u32 48, %s1371_s10  ;;  %s448_s14 = scalar_lea.vmem %s1491_s7, %s1371_s10  ;;  %v457_v5 = vld [vmem:[%s1484_s0] sm:$0xf] (%p450_p5)  ;;  %v516_v29 = vand.u32 (%p450_p5), 127, %v515_v28 }
  0x10   : > { %s1201_s15 = smul.u32 3, %s1371_s10  ;;  %483 = vmatpush.msra.mxu0 (%p450_p5), %v460_v1  ;;  %v1236_v6 = vld [vmem:[%s1486_s2] ss:$0 sm:$0xff] (%p450_p5) }
  0x11   : > { %s1382_s18 = scalar_lea.vmem %s1488_s4, %s1200_s11  ;;  %s1202_s19 = smul.u32 160, %s1371_s10 }
  0x12   : > { %s1388_s22 = scalar_lea.vmem %s1489_s5, %s1201_s15  ;;  %455 = sbr.rel (!%p450_p5) target bundleno = 1143 (0x477), region = 56  ;;  %484 = vmatpush.msra.mxu0 (%p450_p5), %v459_v3 }
  0x13   : > { %s1393_s25 = scalar_lea.vmem %s1490_s6, %s1202_s19 }
  0x14   : > { %485 = vmatpush.msra.mxu0 (%p450_p5), %v458_v4 }
  0x15   : > { %1058 = vmatmul.msk.f32.vlgmr.msra.gmra.mxu0 (%p450_p5), %vm466_vm0, %v457_v5 }
  0x92   : > { %v487_v7 = vpop.f32.mrf.mxu0 }
  0x93   : > { %v488_v8 = vadd.f32 %v1236_v6, %v487_v7 }
  0x95   : > { %v491_v9 = vsel %vm490_vm1, %v488_v8, -inf }
  0x96   : > { %492 = vmax.xlane.f32.xlu0 %v491_v9 }
 0x109   : > { %v493_v10 = vpop.xlane.xlu0 %492 }
 0x10a   : > { %v494_v11 = vsub.f32 %v488_v8, %v493_v10 }
 0x10c   : > { %v495_v12 = vmul.f32 1.442695, %v494_v11 }
 0x10e   : > { %1237 = vpow2.f32 %v495_v12 }
 0x114   : > { %v1238_v13 = vpop.eup %1237 }
 0x115   : > { %v497_v14 = vsel %vm490_vm1, %v1238_v13, 0.0 }
 0x116   : > { %498 = vadd.xlane.f32.xlu0 %v497_v14 }
 0x189   : > { %v499_v15 = vpop.xlane.xlu0 %498 }
 0x18a   : > { %1239 = vrcp.f32 %v499_v15  ;;  %v511_v19 = vand.u32 2147483648, %v499_v15  ;;  %v509_v21 = vand.u32 2147483647, %v499_v15  ;;  %vm505_vm3 = vweird.f32 %v499_v15 }
 0x18c   : > { %v512_v23 = vor.u32 1.1754944e-38, %v511_v19  ;;  %vm510_vm5 = vcmp.eq.f32.partialorder %v509_v21, 8.507059e+37 }
 0x190   : > { %v1240_v16 = vpop.eup %1239 }
 0x191   : > { %v501_v17 = vmul.f32 %v1240_v16, %v499_v15  ;;  %vm506_vm2 = vweird.f32 %v1240_v16 }
 0x192   : > { %vm507_vm4 = vmor %vm505_vm3, %vm506_vm2 }
 0x193   : > { %v502_v18 = vsub.f32 1.0, %v501_v17 }
 0x195   : > { %v503_v20 = vmul.f32 %v1240_v16, %v502_v18 }
 0x197   : > { %v504_v22 = vadd.f32 %v1240_v16, %v503_v20 }
 0x199   : > { %v508_v24 = vsel %vm507_vm4, %v1240_v16, %v504_v22 }
 0x19a   : > { %v513_v25 = vsel %vm510_vm5, %v512_v23, %v508_v24 }
 0x19b   : > { %v514_v26 = vmul.f32 %v1238_v13, %v513_v25 }
 0x19d   : > { %v517_v27 = vsel %vm490_vm1, %v514_v26, -inf }
 0x19e   : > { %518 = vmax.xlane.f32.xlu1 %v517_v27 }
 0x211   : > { %v519_v30 = vpop.xlane.xlu1 %518 }
 0x212   : > { %vm520_vm6 = vcmp.eq.f32.partialorder %v514_v26, %v519_v30 }
 0x213   : > { %v521_v31 = vsel %vm520_vm6, %v516_v29, 4 }
 0x214   : > { %v522_v32 = vsel %vm490_vm1, %v521_v31, 2147483647 }
 0x215   : > { %v524_v33 = vshra.s32 %v522_v32, 16  ;;  %v523_v35 = vand.u32 65535, %v522_v32 }
 0x217   : > { %v526_v34 = vcvt.s32.f32 %v524_v33  ;;  %v525_v37 = vcvt.s32.f32 %v523_v35 }
 0x219   : > { %527 = vmin.xlane.f32.xlu1 %v526_v34 }
 0x28c   : > { %v528_v36 = vpop.xlane.xlu1 %527 }
 0x28d   : > { %vm529_vm7 = vcmp.eq.f32.partialorder %v526_v34, %v528_v36  ;;  %v534_v39 = vcvt.f32.s32 %v528_v36 }
 0x28e   : > { %v530_v38 = vsel %vm529_vm7, %v525_v37, inf }
 0x28f   : > { %531 = vmin.xlane.f32.xlu2 %v530_v38  ;;  %v535_v41 = vshll.u32 %v534_v39, 16 }
 0x302   : > { %v532_v40 = vpop.xlane.xlu2 %531 }
 0x303   : > { %v533_v42 = vcvt.f32.s32 %v532_v40 }
 0x305   : > { %v536_v43 = vadd.s32 %v535_v41, %v533_v42 }
 0x307   : > { %vm537_vm8 = vcmp.eq.s32.totalorder %v516_v29, %v536_v43 }
 0x308   : > { %v538_v44 = vsel %vm537_vm8, -inf, %v514_v26 }
 0x309   : > { %v539_v45 = vsel %vm490_vm1, %v538_v44, -inf }
 0x30a   : > { %540 = vmax.xlane.f32.xlu2 %v539_v45 }
 0x37d   : > { %v541_v46 = vpop.xlane.xlu2 %540 }
 0x37e   : > { %vm542_vm9 = vcmp.eq.f32.partialorder %v538_v44, %v541_v46 }
 0x37f   : > { %v543_v47 = vsel %vm542_vm9, %v516_v29, 4 }
 0x380   : > { %v544_v48 = vsel %vm490_vm1, %v543_v47, 2147483647 }
 0x381   : > { %v546_v49 = vshra.s32 %v544_v48, 16  ;;  %v545_v51 = vand.u32 65535, %v544_v48 }
 0x383   : > { %v548_v50 = vcvt.s32.f32 %v546_v49  ;;  %v547_v53 = vcvt.s32.f32 %v545_v51 }
 0x385   : > { %549 = vmin.xlane.f32.xlu0 %v548_v50 }
 0x3f8   : > { %v550_v52 = vpop.xlane.xlu0 %549 }
 0x3f9   : > { %vm551_vm10 = vcmp.eq.f32.partialorder %v548_v50, %v550_v52  ;;  %v556_v55 = vcvt.f32.s32 %v550_v52 }
 0x3fa   : > { %v552_v54 = vsel %vm551_vm10, %v547_v53, inf }
 0x3fb   : > { %553 = vmin.xlane.f32.xlu1 %v552_v54  ;;  %v557_v57 = vshll.u32 %v556_v55, 16 }
 0x46e   : > { %v554_v56 = vpop.xlane.xlu1 %553 }
 0x46f   : > { %v555_v58 = vcvt.f32.s32 %v554_v56 }
 0x471   : > { %v558_v59 = vadd.s32 %v557_v57, %v555_v58 }
 0x473   : > { %vm559_vm11 = vcmp.eq.s32.totalorder %v516_v29, %v558_v59 }
 0x474   : > { %vm560_vm12 = vmor %vm537_vm8, %vm559_vm11 }
 0x475   : > { %v561_v60 = vsel %vm560_vm12, %v514_v26, 0.0 }
 0x476   : > { %562 = vst.msk [vmem:[#allocation2] sm:$0xf] %vm490_vm1, %v561_v60 }
 0x477 PF: > { %v1073_v61 = vld [vmem:[%s1382_s18 + $0x18] sm:$0xf]  ;;  %v1177_v62 = vld [vmem:[%s1382_s18 + $0x20] sm:$0xf0]  ;;  %v1061_v63 = vld [vmem:[%s1382_s18] sm:$0xf]  ;;  %v567_v2 = vlaneseq  ;;  %v569_v14 = vstv %s1289_s27 }
 0x478   : > { %v1074_v0 = vor.u32 %v1177_v62, %v1073_v61  ;;  %v1174_v1 = vld [vmem:[%s1382_s18 + $0x8] sm:$0xf0]  ;;  %v1081_v3 = vld [vmem:[%s1382_s18 + $0x20] sm:$0xf]  ;;  %v1176_v5 = vld [vmem:[%s1382_s18 + $0x1c] sm:$0xf] }
 0x479   : > { %v1178_v4 = vld [vmem:[%s1382_s18 + $0x28] sm:$0xf0]  ;;  %v1062_v6 = vor.u32 %v1174_v1, %v1061_v63  ;;  %v1075_v7 = vld [vmem:[%s1382_s18 + $0x24] sm:$0xf0]  ;;  %v1175_v11 = vld [vmem:[%s1382_s18 + $0x10] sm:$0xf0] }
 0x47a   : > { %638 = vmatpush.bf16.msra.mxu2 %v1074_v0  ;;  %v1069_v8 = vld [vmem:[%s1382_s18 + $0x8] sm:$0xf]  ;;  %v1082_v9 = vor.u32 %v1178_v4, %v1081_v3  ;;  %v1078_v10 = vor.u32 %v1176_v5, %v1075_v7  ;;  %v1173_v12 = vld [vmem:[%s1382_s18 + $0x4] sm:$0xf]  ;;  %v1063_v13 = vld [vmem:[%s1382_s18 + $0xc] sm:$0xf0] }
 0x47b   : > { %v568_v16 = vand.u32 127, %v567_v2  ;;  %v1186_v17 = vld [vmem:[%s1393_s25 + $0x38] sm:$0xff]  ;;  %v1066_v19 = vor.u32 %v1173_v12, %v1063_v13  ;;  %vm572_vm13 = vcmask 27648   ;;  %v579_v20 = vld [vmem:[%s1487_s3] sm:$0x3]  ;;  %vm628_vm14 = vcmask 261120  }
 0x47c   : > { %v1194_v18 = vld [vmem:[%s1393_s25 + $0x78] sm:$0xff]  ;;  %651 = vmatpush.bf16.msra.mxu1 %v1078_v10  ;;  %841 = vmatpush.bf16.msra.mxu3 %v1186_v17  ;;  %v1185_v21 = vld [vmem:[%s1393_s25 + $0x30] sm:$0xff]  ;;  %v1070_v22 = vor.u32 %v1175_v11, %v1069_v8  ;;  %v1184_v26 = vld [vmem:[%s1393_s25 + $0x28] sm:$0xff]  ;;  %vm576_vm0 = vcmask 3072   ;;  %v1300_v44 = vmov 0   ;;  %vm837_vm1 = vcmask 523264  }
 0x47d   : > { %v566_v15 = vld [vmem:[#allocation2] sm:$0xf]  ;;  %vm570_vm15 = vcmp.eq.s32.totalorder %v568_v16, %v569_v14  ;;  %854 = vmatpush.bf16.msra.mxu0 %v1194_v18  ;;  %v1193_v24 = vld [vmem:[%s1393_s25 + $0x70] sm:$0xff]  ;;  %v1192_v27 = vld [vmem:[%s1393_s25 + $0x68] sm:$0xff]  ;;  %1241 = vset.pattern.permute.xlu0 %v1300_v44  ;;  %p900_p6 = scmp.eq.s32.totalorder %s1289_s27, 3 }
 0x47e   : > { %639 = vmatpush.bf16.msra.mxu2 %v1062_v6  ;;  %v571_v23 = vsel %vm570_vm15, %v566_v15, 0.0  ;;  %v1183_v28 = vld [vmem:[%s1393_s25 + $0x20] sm:$0xff]  ;;  %v1182_v30 = vld [vmem:[%s1393_s25 + $0x18] sm:$0xff]  ;;  %v1181_v32 = vld [vmem:[%s1393_s25 + $0x10] sm:$0xff] }
 0x47f   : > { %v573_v25 = vsel %vm572_vm13, %v571_v23, 0.0  ;;  %v1191_v29 = vld [vmem:[%s1393_s25 + $0x60] sm:$0xff]  ;;  %v1190_v31 = vld [vmem:[%s1393_s25 + $0x58] sm:$0xff]  ;;  %v1180_v33 = vld [vmem:[%s1393_s25 + $0x8] sm:$0xff] }
 0x480   : > { %652 = vmatpush.bf16.msra.mxu1 %v1066_v19  ;;  %574 = vadd.xlane.f32.xlu0 %v573_v25  ;;  %v1189_v34 = vld [vmem:[%s1393_s25 + $0x50] sm:$0xff]  ;;  %v1179_v35 = vld [vmem:[%s1393_s25] sm:$0xff]  ;;  %v1188_v36 = vld [vmem:[%s1393_s25 + $0x48] sm:$0xff] }
 0x481   : > { %1083 = vmatmul.msk.bf16.vlgmr.msra.gmra.mxu2 %vm628_vm14, %v579_v20  ;;  %842 = vmatpush.bf16.msra.mxu3 %v1185_v21  ;;  %v1198_v37 = vld [vmem:[%s1393_s25 + $0x98] sm:$0xff]  ;;  %v1187_v38 = vld [vmem:[%s1393_s25 + $0x40] sm:$0xff]  ;;  %v1197_v39 = vld [vmem:[%s1393_s25 + $0x90] sm:$0xff] }
 0x482   : > { %664 = vmatpush.bf16.msrb.mxu2 %v1082_v9  ;;  %855 = vmatpush.bf16.msra.mxu0 %v1193_v24  ;;  %v1196_v40 = vld [vmem:[%s1393_s25 + $0x88] sm:$0xff]  ;;  %v1195_v41 = vld [vmem:[%s1393_s25 + $0x80] sm:$0xff] }
 0x483   : > { %1084 = vmatmul.msk.bf16.vlgmr.msra.gmra.mxu1 %vm628_vm14, %v579_v20  ;;  %v588_v43 = vld [vmem:[%s1388_s22] sm:$0x7]  ;;  %v880_v8 = vld [vmem:[#allocation4] sm:$0xf] }
 0x484   : > { %871 = vmatpush.bf16.msrb.mxu1 %v1198_v37  ;;  %v591_v45 = vperm.slane %v588_v43, 1  ;;  %v590_v46 = vperm.slane %v588_v43, 0  ;;  %v592_v58 = vperm.slane %v588_v43, 2  ;;  %v1242_v12 = vld [vmem:[%s448_s14] ss:$0 sm:$0xff] }
 0x485   : > { %843 = vmatpush.bf16.msra.mxu3 %v1184_v26 }
 0x486   : > { %665 = vmatpush.bf16.msrb.mxu2 %v1070_v22  ;;  %856 = vmatpush.bf16.msra.mxu0 %v1192_v27 }
 0x488   : > { %872 = vmatpush.bf16.msrb.mxu1 %v1197_v39 }
 0x489   : > { %844 = vmatpush.bf16.msra.mxu3 %v1183_v28 }
 0x48a   : > { %857 = vmatpush.bf16.msra.mxu0 %v1191_v29 }
 0x48c   : > { %873 = vmatpush.bf16.msrb.mxu1 %v1196_v40 }
 0x48d   : > { %845 = vmatpush.bf16.msra.mxu3 %v1182_v30 }
 0x48e   : > { %858 = vmatpush.bf16.msra.mxu0 %v1190_v31 }
 0x490   : > { %874 = vmatpush.bf16.msrb.mxu1 %v1195_v41 }
 0x491   : > { %1085 = vmatmul.msk.bf16.vlgmr.msrb.gmra.mxu2 %vm628_vm14, %v579_v20  ;;  %846 = vmatpush.bf16.msra.mxu3 %v1181_v32 }
 0x492   : > { %859 = vmatpush.bf16.msra.mxu0 %v1189_v34 }
 0x495   : > { %847 = vmatpush.bf16.msra.mxu3 %v1180_v33 }
 0x496   : > { %860 = vmatpush.bf16.msra.mxu0 %v1188_v36 }
 0x499   : > { %848 = vmatpush.bf16.msra.mxu3 %v1179_v35 }
 0x49a   : > { %861 = vmatpush.bf16.msra.mxu0 %v1187_v38 }
 0x4f3   : > { %v575_v42 = vpop.xlane.xlu0 %574 }
 0x4f4   : > { %577 = vst.msk [vmem:[#allocation3] sm:$0xf] %vm576_vm0, %v575_v42 }
 0x4fb   : > { %v578_v51 = vld [vmem:[#allocation3] sm:$0xf] }
 0x4fc   : > { %883 = vperm.xlu0 %1241, %v578_v51  }
 0x500   : > { %v654_v47 = vpop.f32.mrf.mxu1 }
 0x501   : > { %v655_v48 = vadd.f32 %v654_v47, %v591_v45 }
 0x503   : > { %v672_v50 = vmax.f32 %v655_v48, 0.0 }
 0x504   : > { %v641_v49 = vpop.f32.mrf.mxu2 }
 0x505   : > { %v642_v52 = vadd.f32 %v641_v49, %v590_v46  ;;  %v675_v53 = vpack.c.bf16 %v672_v50, %v672_v50 }
 0x507   : > { %v671_v54 = vmax.f32 %v642_v52, 0.0  ;;  %862 = vmatmul.bf16.vlgmr.msra.gmra.mxu0 %v675_v53 }
 0x508   : > { %v656_v56 = vpop.f32.mrf.mxu1 }
 0x509   : > { %v674_v55 = vpack.c.bf16 %v671_v54, %v671_v54 }
 0x50b   : > { %849 = vmatmul.bf16.vlgmr.msra.gmra.mxu3 %v674_v55 }
 0x50c   : > { %v643_v57 = vpop.f32.mrf.mxu2 }
 0x514   : > { %v667_v59 = vpop.f32.mrf.mxu2 }
 0x515   : > { %v668_v60 = vadd.f32 %v667_v59, %v592_v58 }
 0x517   : > { %v673_v61 = vmax.f32 %v668_v60, 0.0 }
 0x519   : > { %v676_v62 = vpack.c.bf16 %v673_v61, %v673_v61 }
 0x51b   : > { %1166 = vmatmul.msk.bf16.vlgmr.msrb.gmra.mxu1 %vm837_vm1, %v676_v62 }
 0x51c   : > { %v669_v63 = vpop.f32.mrf.mxu2 }
 0x56e   : > { %v884_v6 = vpop.permute.xlu0 %883 }
 0x56f   : > { %v897_v13 = vmul.f32 %v1242_v12, %v884_v6 }
 0x584   : > { %v863_v0 = vpop.f32.mrf.mxu0 }
 0x58c   : > { %v865_v1 = vpop.f32.mrf.mxu0 }
 0x58e   : > { %v850_v2 = vpop.f32.mrf.mxu3 }
 0x58f   : > { %v864_v4 = vadd.f32 %v863_v0, %v850_v2 }
 0x596   : > { %v852_v3 = vpop.f32.mrf.mxu3 }
 0x598   : > { %v876_v5 = vpop.f32.mrf.mxu1 }
 0x599   : > { %v877_v7 = vadd.f32 %v876_v5, %v864_v4 }
 0x59b   : > { %v886_v9 = vmul.f32 %v884_v6, %v877_v7 }
 0x59d   : > { %v887_v10 = vadd.f32 %v886_v9, %v880_v8 }
 0x59f   : > { %888 = vst [vmem:[#allocation4] sm:$0xf] %v887_v10 }
 0x5a0   : > { %v878_v11 = vpop.f32.mrf.mxu1 }
 0x5a5   : > { %904 = sbr.rel (!%p900_p6) target bundleno = 1458 (0x5b2), region = 68 }
 0x5a6   : > { %v892_v14 = vld [vmem:[#allocation4] sm:$0xf] }
 0x5a7   : > { %v898_v15 = vadd.f32 %v897_v13, %v892_v14 }
 0x5a9   : > { %899 = vst [vmem:[#allocation4] sm:$0xf] %v898_v15 }
 0x5b0   : > { %v905_v16 = vld [vmem:[#allocation4] sm:$0xf] }
 0x5b1   : > { %906 = vst [vmem:[#allocation5] sm:$0xf] %v905_v16 }
 0x5b2 PF: > { %p1207_p7 = scmp.eq.s32.totalorder %s1049_s30, 3  ;;  %s917_s16 = sshll.u32 %s1492_s8, 4  ;;  %s918_s16 = int_to_ptr.hbm [resolvable:$true] %s917_s16 }
 0x5b3   : > { %s1301_s11 = smov [#allocation5]  }
 0x5b4   : > { %s915_s10 = sshll.u32 %s1301_s11, 4  ;;  %s916_s10 = int_to_ptr.vmem [resolvable:$true] %s915_s10 }
 0x5b5   : > { %1204 = dma.vmem_to_hbm [thread:$0]  (%p1207_p7), %s916_s10, 64, %s918_s16, [#allocation6]  }
 0x5b6   : > { %1284 = dma.done.wait (%p1207_p7), [#allocation6], 64  }
 0x5b7   : > { %1286 = vsyncadd (%p1207_p7), [#allocation6], 4294967232 }
 0x5b8 PF: > { %s19_s29 = sadd.s32 1, %s1297_s29   ;;  %s1493_s27 = smov %s1293_s28 }
 0x5b9   : > { %p16_p8 = scmp.ge.s32.totalorder %s19_s29, 6   ;;  %s1494_s28 = smov %s1496_s9 }
 0x5bb   :  { %18 = sbr.rel (!%p16_p8) target bundleno = 2 (0x2), region = 111 }
 0x5c0   :  { %931 = vsyncpa [#allocation6], 1 }
 0x5c1   :  { %933 = vsyncpa [#allocation6 + $0x1], 1 }

</bundles_post_ra>
